<compile_context>
chip_gen: v7x
topology: tpu7x:2x2x1
jax: 0.10.0
libtpu: 0.0.40
codegen_flags: <defaults>
</compile_context>

<pallas_src>
import math
import functools

import jax
import jax.numpy as jnp
from jax import lax
from jax.experimental import pallas as pl
from jax.experimental.pallas import tpu as pltpu

LN_EPS = 1e-5  # PyTorch nn.LayerNorm default


def _round_up(x, m):
    return (x + m - 1) // m * m


# ----------------------------- kernel -----------------------------

def conv1d_block_kernel(len_ref, halo_ref, cur_ref, g_ref, b_ref, w_ref, cb_ref, o_ref,
                        *, cin, kernel_size, dilation, causal_pad, halo_rows):
    """Fused masked_fill + LayerNorm(Cin) + causal Conv1d (im2col matmul).

    Block shapes (Cp/Cop are 128-multiples, S_blk a multiple of 8):
      len_ref  : (TB, 1)              int32  per-batch valid length
      halo_ref : (TB, HALO, Cp)       x      previous time block (last P rows are the halo)
      cur_ref  : (TB, S_blk, Cp)      x      current time block
      g_ref,b_ref : (1, Cp)           f32    LayerNorm affine (zero on channel-pad lanes)
      w_ref    : (K*Cp, Cop)          bf16   im2col conv weight (tap-major rows)
      cb_ref   : (1, Cop)             f32    conv bias
      o_ref    : (TB, S_blk, Cop)     f32
    """
    tb, s_blk, cop = o_ref.shape
    cp = cur_ref.shape[-1]
    p = causal_pad
    t0 = pl.program_id(1) * s_blk                        # global time of this block's row 0

    # ---- assemble [causal halo rows | current rows] --------------------------------
    if p > 0:
        halo = halo_ref[:, halo_rows - p:, :]            # last P rows of previous block
        x = jnp.concatenate([halo, cur_ref[...]], axis=1)
    else:
        x = cur_ref[...]
    x = x.astype(jnp.float32)
    s_in = s_blk + (p if p > 0 else 0)

    # global time per row; halo rows of the very first block have t < 0 (== causal pad)
    t = lax.broadcasted_iota(jnp.int32, (tb, s_in, 1), 1) + (t0 - (p if p > 0 else 0))
    length = len_ref[...].reshape(tb, 1, 1)              # (TB,1,1) int32

    # masked_fill(padding_mask, 0): zero padded timesteps BEFORE LayerNorm
    x = jnp.where(t >= length, 0.0, x)

    # ---- LayerNorm over the real cin channels (two-pass, pad lanes masked) ---------
    chan = (lax.broadcasted_iota(jnp.int32, (1, 1, cp), 2) < cin).astype(jnp.float32)
    inv_c = 1.0 / cin
    mu = jnp.sum(x, axis=-1, keepdims=True) * inv_c
    d = (x - mu) * chan                                  # exactly 0 on channel-pad lanes
    var = jnp.sum(d * d, axis=-1, keepdims=True) * inv_c
    xn = d * lax.rsqrt(var + LN_EPS) * g_ref[...] + b_ref[...]

    # causal left-pad rows (t < 0) are exactly 0 (F.pad is applied AFTER the LayerNorm)
    xn = jnp.where(t >= 0, xn, 0.0)

    # ---- conv as one im2col MXU matmul (bf16 operands, f32 accumulation) -----------
    xb = xn.astype(jnp.bfloat16)                         # single cast, hoisted out of taps
    if kernel_size == 1:
        xi = xb
    else:
        xi = jnp.concatenate(
            [xb[:, j * dilation:j * dilation + s_blk, :] for j in range(kernel_size)],
            axis=-1)                                     # (TB, S_blk, K*Cp)
    y = jnp.dot(xi.reshape(tb * s_blk, kernel_size * cp), w_ref[...],
                preferred_element_type=jnp.float32)      # (TB*S_blk, Cop)
    o_ref[...] = (y + cb_ref[...]).reshape(tb, s_blk, cop)


# ----------------------------- wrapper -----------------------------

def _auto_seq_tile(vmem_cap, tb, cp, cop, k, halo):
    """Pick a time-block size whose per-step VMEM footprint fits the chip's VMEM."""
    budget = vmem_cap // 3                               # headroom: weights + pipelining
    per_row = tb * (2 * cp * 4          # x block, double-buffered f32 DMA
                    + 2 * cop * 4       # out block, double-buffered
                    + 3 * cp * 4        # in-kernel f32 temporaries
                    + (k + 1) * cp * 2  # bf16 xb + im2col
                    + cop * 4)          # f32 matmul result
    s = (budget // max(per_row, 1)) // halo * halo
    return int(max(halo, min(s, 1024)))


def conv1d_block(x, lengths, params, *, kernel_size, dilation=1, stride=1, groups=1,
                 batch_tile=None, seq_tile=None):
    """x: (B, T, Cin) f32/bf16; lengths: (B,) int valid lengths (timestep t is padded
    iff t >= lengths[b], i.e. the suffix padding_mask of the PyTorch module) or None."""
    if groups != 1:
        # TODO(synk): grouped Conv1d not implemented in the Pallas kernel.
        raise NotImplementedError("groups > 1 not supported")
    # TODO(synk): arbitrary (non-suffix) padding masks are not supported; the wrapper
    # takes per-batch valid lengths so masks are rebuilt in-kernel from iota compares.

    B, T, Cin = x.shape
    Cout, Cin_w, K = params["conv_w"].shape
    assert Cin_w == Cin and K == kernel_size

    P = (kernel_size - 1) * dilation                     # causal_padding
    Cp = _round_up(Cin, 128)                             # lane-dense input channels
    Cop = _round_up(Cout, 128)                           # lane-dense output channels
    HALO = _round_up(max(P, 1), 8)                       # sublane-aligned halo block rows

    TB = min(B, 8) if batch_tile is None else max(1, min(batch_tile, B))
    if TB < B and TB % 8 != 0:
        TB = min(B, 8)                                   # keep (8, x) tiling legal
    Bp = _round_up(B, TB)

    try:
        vmem_cap = pltpu.get_tpu_info().vmem_capacity_bytes
    except Exception:
        vmem_cap = 64 * 1024 * 1024                      # v7x-safe fallback
    if seq_tile is None:
        seq_tile = _auto_seq_tile(vmem_cap, TB, Cp, Cop, K, HALO)
    S_blk = min(_round_up(max(seq_tile, HALO), HALO), _round_up(T, HALO))
    S_pad = _round_up(T, S_blk)

    # --- alignment padding ONLY when needed (no wrapper-side causal left-pad) -------
    if (Bp, S_pad, Cp) != (B, T, Cin):
        xp = jnp.pad(x, ((0, Bp - B), (0, S_pad - T), (0, Cp - Cin)))
    else:
        xp = x

    if lengths is None:
        lengths = jnp.full((B,), T, jnp.int32)
    lens = jnp.zeros((Bp, 1), jnp.int32).at[:B, 0].set(lengths.astype(jnp.int32))

    g = jnp.zeros((1, Cp), jnp.float32).at[0, :Cin].set(params["ln_g"].astype(jnp.float32))
    b = jnp.zeros((1, Cp), jnp.float32).at[0, :Cin].set(params["ln_b"].astype(jnp.float32))
    w = jnp.zeros((K, Cp, Cop), jnp.float32)
    w = w.at[:, :Cin, :Cout].set(jnp.transpose(params["conv_w"], (2, 1, 0)).astype(jnp.float32))
    w = w.reshape(K * Cp, Cop).astype(jnp.bfloat16)      # im2col weight, tap-major rows
    cb = jnp.zeros((1, Cop), jnp.float32).at[0, :Cout].set(params["conv_b"].astype(jnp.float32))

    grid = (Bp // TB, S_pad // S_blk)
    nhb = S_blk // HALO                                  # halo blocks per time block

    kernel = functools.partial(conv1d_block_kernel, cin=Cin, kernel_size=K,
                               dilation=dilation, causal_pad=P, halo_rows=HALO)

    cost = pl.CostEstimate(
        flops=int(2 * Bp * S_pad * K * Cin * Cout + 10 * Bp * S_pad * Cin),
        transcendentals=int(Bp * S_pad),
        bytes_accessed=int(xp.size * xp.dtype.itemsize + Bp * S_pad * Cop * 4 + w.size * 2))

    # TODO(synk): w/g/b/cb have constant index_maps (no re-DMA); once pipeline_mode=
    # pl.Buffered(1) is universally available, single-buffer them to reclaim VMEM.
    out = pl.pallas_call(
        kernel,
        out_shape=jax.ShapeDtypeStruct((Bp, S_pad, Cop), jnp.float32),
        grid=grid,
        in_specs=[
            pl.BlockSpec((TB, 1), lambda bi, si: (bi, 0)),
            pl.BlockSpec((TB, HALO, Cp),
                         lambda bi, si: (bi, jnp.maximum(si * nhb - 1, 0), 0)),
            pl.BlockSpec((TB, S_blk, Cp), lambda bi, si: (bi, si, 0)),
            pl.BlockSpec((1, Cp), lambda bi, si: (0, 0)),
            pl.BlockSpec((1, Cp), lambda bi, si: (0, 0)),
            pl.BlockSpec((K * Cp, Cop), lambda bi, si: (0, 0)),
            pl.BlockSpec((1, Cop), lambda bi, si: (0, 0)),
        ],
        out_specs=pl.BlockSpec((TB, S_blk, Cop), lambda bi, si: (bi, si, 0)),
        compiler_params=pltpu.CompilerParams(
            dimension_semantics=("parallel", "parallel"),
            vmem_limit_bytes=int(min(vmem_cap, 128 * 1024 * 1024) * 3 // 4)),
        cost_estimate=cost,
    )(lens, xp, xp, g, b, w, cb)

    out = out[:B, :T, :Cout]                             # strip alignment padding
    if stride > 1:
        # TODO(synk): stride>1 is computed at stride 1 then subsampled (exact but does
        # stride-x extra work); an in-kernel strided output BlockSpec would avoid it.
        out = out[:, ::stride]
    return out


# ----------------------------- pure-JAX reference -----------------------------

def conv1d_block_ref(x, padding_mask, params, *, kernel_size, dilation=1, stride=1):
    if padding_mask is not None:
        x = jnp.where(padding_mask, 0.0, x)
    mu = jnp.mean(x, axis=-1, keepdims=True)
    var = jnp.mean((x - mu) ** 2, axis=-1, keepdims=True)
    xn = (x - mu) / jnp.sqrt(var + LN_EPS) * params["ln_g"] + params["ln_b"]

    P = (kernel_size - 1) * dilation
    xe = jnp.pad(xn, ((0, 0), (P, 0), (0, 0)))
    T = x.shape[1]
    w = jnp.transpose(params["conv_w"], (2, 1, 0))       # (K, Cin, Cout)
    y = params["conv_b"]
    for j in range(kernel_size):
        y = y + jnp.einsum("btc,co->bto", xe[:, j * dilation:j * dilation + T, :], w[j])
    if stride > 1:
        y = y[:, ::stride]
    return y


# ----------------------------- main -----------------------------

if __name__ == "__main__":
    B, T, Cin, Cout = 2, 16, 32, 64
    K, DIL, STRIDE = 3, 2, 1

    key = jax.random.PRNGKey(0)
    kx, kg, kb, kw, kcb = jax.random.split(key, 5)

    x = jax.random.normal(kx, (B, T, Cin), dtype=jnp.float32)
    lengths = jnp.array([T, T - 5], dtype=jnp.int32)
    padding_mask = (jnp.arange(T)[None, :] >= lengths[:, None])[..., None]   # (B, T, 1)

    bound = 1.0 / math.sqrt(Cin * K)
    params = {
        "ln_g": 1.0 + 0.1 * jax.random.normal(kg, (Cin,), jnp.float32),
        "ln_b": 0.1 * jax.random.normal(kb, (Cin,), jnp.float32),
        "conv_w": jax.random.uniform(kw, (Cout, Cin, K), jnp.float32, -bound, bound),
        "conv_b": jax.random.uniform(kcb, (Cout,), jnp.float32, -bound, bound),
    }

    out = conv1d_block(x, lengths, params,
                       kernel_size=K, dilation=DIL, stride=STRIDE)
    out = jax.block_until_ready(out)

    ref = conv1d_block_ref(x, padding_mask, params,
                           kernel_size=K, dilation=DIL, stride=STRIDE)

    assert out.shape == ref.shape == (B, T, Cout), (out.shape, ref.shape)
    assert bool(jnp.all(jnp.isfinite(out)))
    max_err = float(jnp.max(jnp.abs(out - ref)))
    assert max_err < 5e-2, f"max abs err {max_err}"      # loose tol: bf16 MXU operands
    print("KERNEL_OK")
</pallas_src>

<mosaic_0001>
module attributes {stable_mosaic.version = 11 : i64} {
  func.func @conv1d_block_kernel(%arg0: i32, %arg1: i32, %arg2: memref<2x1xi32, #tpu.memory_space<vmem>>, %arg3: memref<2x8x128xf32, #tpu.memory_space<vmem>>, %arg4: memref<2x16x128xf32, #tpu.memory_space<vmem>>, %arg5: memref<1x128xf32, #tpu.memory_space<vmem>>, %arg6: memref<1x128xf32, #tpu.memory_space<vmem>>, %arg7: memref<384x128xbf16, #tpu.memory_space<vmem>>, %arg8: memref<1x128xf32, #tpu.memory_space<vmem>>, %arg9: memref<2x16x128xf32, #tpu.memory_space<vmem>>) attributes {dimension_semantics = [#tpu.dimension_semantics<parallel>, #tpu.dimension_semantics<parallel>], iteration_bounds = array<i64: 1, 1>, scalar_prefetch = 0 : i64, scratch_operands = 0 : i64, tpu.core_type = #tpu.core_type<tc>, window_params = [{transform_indices = @transform_0, window_bounds = array<i64: 2, 1>}, {transform_indices = @transform_1, window_bounds = array<i64: 2, 8, 128>}, {transform_indices = @transform_2, window_bounds = array<i64: 2, 16, 128>}, {pipeline_mode = #tpu.pipeline_mode<synchronous>, transform_indices = @transform_3, window_bounds = array<i64: 1, 128>}, {pipeline_mode = #tpu.pipeline_mode<synchronous>, transform_indices = @transform_4, window_bounds = array<i64: 1, 128>}, {pipeline_mode = #tpu.pipeline_mode<synchronous>, transform_indices = @transform_5, window_bounds = array<i64: 384, 128>}, {pipeline_mode = #tpu.pipeline_mode<synchronous>, transform_indices = @transform_6, window_bounds = array<i64: 1, 128>}, {transform_indices = @transform_7, window_bounds = array<i64: 2, 16, 128>}]} {
    %c16_i32 = arith.constant 16 : i32
    %0 = arith.muli %arg1, %c16_i32 : i32
    %c0 = arith.constant 0 : index
    %c4 = arith.constant 4 : index
    %c0_0 = arith.constant 0 : index
    %1 = vector.load %arg3[%c0, %c4, %c0_0] : memref<2x8x128xf32, #tpu.memory_space<vmem>>, vector<2x4x128xf32>
    %c0_1 = arith.constant 0 : index
    %c0_2 = arith.constant 0 : index
    %c0_3 = arith.constant 0 : index
    %2 = vector.load %arg4[%c0_1, %c0_2, %c0_3] : memref<2x16x128xf32, #tpu.memory_space<vmem>>, vector<2x16x128xf32>
    %3 = tpu.concatenate %1, %2 in 1 : vector<2x4x128xf32>, vector<2x16x128xf32> -> vector<2x20x128xf32>
    %4 = tpu.iota {dimensions = array<i32: 1>} : vector<2x20x1xi32>
    %c4_i32 = arith.constant 4 : i32
    %5 = arith.subi %0, %c4_i32 : i32
    %6 = vector.broadcast %5 : i32 to vector<2x20x1xi32>
    %7 = arith.addi %4, %6 : vector<2x20x1xi32>
    %c0_4 = arith.constant 0 : index
    %c0_5 = arith.constant 0 : index
    %8 = vector.load %arg2[%c0_4, %c0_5] : memref<2x1xi32, #tpu.memory_space<vmem>>, vector<2x1xi32>
    %9 = vector.shape_cast %8 : vector<2x1xi32> to vector<2x1x1xi32>
    %10 = vector.broadcast %9 : vector<2x1x1xi32> to vector<2x20x1xi32>
    %11 = arith.cmpi sge, %7, %10 : vector<2x20x1xi32>
    %cst = arith.constant 0.000000e+00 : f32
    %12 = vector.shape_cast %11 : vector<2x20x1xi1> to vector<2x20x1xi1>
    %13 = vector.broadcast %12 : vector<2x20x1xi1> to vector<2x20x128xi1>
    %14 = vector.broadcast %cst : f32 to vector<2x20x128xf32>
    %15 = arith.select %13, %14, %3 : vector<2x20x128xi1>, vector<2x20x128xf32>
    %16 = tpu.iota {dimensions = array<i32: 2>} : vector<1x1x128xi32>
    %c32_i32 = arith.constant 32 : i32
    %17 = vector.broadcast %c32_i32 : i32 to vector<1x1x128xi32>
    %18 = arith.cmpi slt, %16, %17 : vector<1x1x128xi32>
    %19 = arith.extui %18 : vector<1x1x128xi1> to vector<1x1x128xi32>
    %20 = arith.sitofp %19 : vector<1x1x128xi32> to vector<1x1x128xf32>
    %cst_6 = arith.constant dense<0.000000e+00> : vector<2x20xf32>
    %21 = vector.multi_reduction <add>, %15, %cst_6 [2] : vector<2x20x128xf32> to vector<2x20xf32>
    %22 = vector.shape_cast %21 : vector<2x20xf32> to vector<2x20x1xf32>
    %cst_7 = arith.constant 3.125000e-02 : f32
    %23 = vector.broadcast %cst_7 : f32 to vector<2x20x1xf32>
    %24 = arith.mulf %22, %23 : vector<2x20x1xf32>
    %25 = vector.broadcast %24 : vector<2x20x1xf32> to vector<2x20x128xf32>
    %26 = arith.subf %15, %25 : vector<2x20x128xf32>
    %27 = vector.broadcast %20 : vector<1x1x128xf32> to vector<2x20x128xf32>
    %28 = arith.mulf %26, %27 : vector<2x20x128xf32>
    %29 = arith.mulf %28, %28 : vector<2x20x128xf32>
    %cst_8 = arith.constant dense<0.000000e+00> : vector<2x20xf32>
    %30 = vector.multi_reduction <add>, %29, %cst_8 [2] : vector<2x20x128xf32> to vector<2x20xf32>
    %31 = vector.shape_cast %30 : vector<2x20xf32> to vector<2x20x1xf32>
    %cst_9 = arith.constant 3.125000e-02 : f32
    %32 = vector.broadcast %cst_9 : f32 to vector<2x20x1xf32>
    %33 = arith.mulf %31, %32 : vector<2x20x1xf32>
    %cst_10 = arith.constant 9.99999974E-6 : f32
    %34 = vector.broadcast %cst_10 : f32 to vector<2x20x1xf32>
    %35 = arith.addf %33, %34 : vector<2x20x1xf32>
    %36 = math.rsqrt %35 : vector<2x20x1xf32>
    %37 = vector.broadcast %36 : vector<2x20x1xf32> to vector<2x20x128xf32>
    %38 = arith.mulf %28, %37 : vector<2x20x128xf32>
    %c0_11 = arith.constant 0 : index
    %c0_12 = arith.constant 0 : index
    %39 = vector.load %arg5[%c0_11, %c0_12] : memref<1x128xf32, #tpu.memory_space<vmem>>, vector<1x128xf32>
    %40 = vector.shape_cast %39 : vector<1x128xf32> to vector<1x1x128xf32>
    %41 = vector.broadcast %40 : vector<1x1x128xf32> to vector<2x20x128xf32>
    %42 = arith.mulf %38, %41 : vector<2x20x128xf32>
    %c0_13 = arith.constant 0 : index
    %c0_14 = arith.constant 0 : index
    %43 = vector.load %arg6[%c0_13, %c0_14] : memref<1x128xf32, #tpu.memory_space<vmem>>, vector<1x128xf32>
    %44 = vector.shape_cast %43 : vector<1x128xf32> to vector<1x1x128xf32>
    %45 = vector.broadcast %44 : vector<1x1x128xf32> to vector<2x20x128xf32>
    %46 = arith.addf %42, %45 : vector<2x20x128xf32>
    %c0_i32 = arith.constant 0 : i32
    %47 = vector.broadcast %c0_i32 : i32 to vector<2x20x1xi32>
    %48 = arith.cmpi sge, %7, %47 : vector<2x20x1xi32>
    %cst_15 = arith.constant 0.000000e+00 : f32
    %49 = vector.shape_cast %48 : vector<2x20x1xi1> to vector<2x20x1xi1>
    %50 = vector.broadcast %49 : vector<2x20x1xi1> to vector<2x20x128xi1>
    %51 = vector.broadcast %cst_15 : f32 to vector<2x20x128xf32>
    %52 = arith.select %50, %46, %51 : vector<2x20x128xi1>, vector<2x20x128xf32>
    %53 = arith.truncf %52 : vector<2x20x128xf32> to vector<2x20x128xbf16>
    %54 = vector.extract_strided_slice %53 {offsets = [0, 0, 0], sizes = [2, 16, 128], strides = [1, 1, 1]} : vector<2x20x128xbf16> to vector<2x16x128xbf16>
    %55 = vector.extract_strided_slice %53 {offsets = [0, 2, 0], sizes = [2, 16, 128], strides = [1, 1, 1]} : vector<2x20x128xbf16> to vector<2x16x128xbf16>
    %56 = vector.extract_strided_slice %53 {offsets = [0, 4, 0], sizes = [2, 16, 128], strides = [1, 1, 1]} : vector<2x20x128xbf16> to vector<2x16x128xbf16>
    %57 = tpu.concatenate %54, %55, %56 in 2 : vector<2x16x128xbf16>, vector<2x16x128xbf16>, vector<2x16x128xbf16> -> vector<2x16x384xbf16>
    %58 = vector.shape_cast %57 : vector<2x16x384xbf16> to vector<32x384xbf16>
    %c0_16 = arith.constant 0 : index
    %c0_17 = arith.constant 0 : index
    %59 = vector.load %arg7[%c0_16, %c0_17] : memref<384x128xbf16, #tpu.memory_space<vmem>>, vector<384x128xbf16>
    %cst_18 = arith.constant dense<0.000000e+00> : vector<32x128xf32>
    %60 = tpu.matmul %58, %59, %cst_18 {dimension_numbers = #tpu.dot_dimension_numbers<[1], [0], [0], [1], [0, 0, 1, 1], [], []>} : vector<32x384xbf16>, vector<384x128xbf16>, vector<32x128xf32> -> vector<32x128xf32>
    %c0_19 = arith.constant 0 : index
    %c0_20 = arith.constant 0 : index
    %61 = vector.load %arg8[%c0_19, %c0_20] : memref<1x128xf32, #tpu.memory_space<vmem>>, vector<1x128xf32>
    %62 = vector.broadcast %61 : vector<1x128xf32> to vector<32x128xf32>
    %63 = arith.addf %60, %62 : vector<32x128xf32>
    %64 = vector.shape_cast %63 : vector<32x128xf32> to vector<2x16x128xf32>
    %c0_21 = arith.constant 0 : index
    %c0_22 = arith.constant 0 : index
    %c0_23 = arith.constant 0 : index
    %65 = vector.load %arg9[%c0_21, %c0_22, %c0_23] : memref<2x16x128xf32, #tpu.memory_space<vmem>>, vector<2x16x128xf32>
    tpu.vector_store %arg9[%c0_21, %c0_22, %c0_23], %64 {strides = array<i32>} : memref<2x16x128xf32, #tpu.memory_space<vmem>>, vector<2x16x128xf32>,
    return
  }
  func.func @transform_0(%arg0: i32, %arg1: i32) -> (i32, i32) {
    %c0_i32 = arith.constant 0 : i32
    %c0_i32_0 = arith.constant 0 : i32
    return %arg0, %c0_i32 : i32, i32
  }
  func.func @transform_1(%arg0: i32, %arg1: i32) -> (i32, i32, i32) {
    %c2_i32 = arith.constant 2 : i32
    %0 = arith.muli %arg1, %c2_i32 : i32
    %c1_i32 = arith.constant 1 : i32
    %1 = arith.subi %0, %c1_i32 : i32
    %c0_i32 = arith.constant 0 : i32
    %2 = arith.maxsi %1, %c0_i32 : i32
    %c0_i32_0 = arith.constant 0 : i32
    %c0_i32_1 = arith.constant 0 : i32
    return %arg0, %2, %c0_i32_0 : i32, i32, i32
  }
  func.func @transform_2(%arg0: i32, %arg1: i32) -> (i32, i32, i32) {
    %c0_i32 = arith.constant 0 : i32
    %c0_i32_0 = arith.constant 0 : i32
    return %arg0, %arg1, %c0_i32 : i32, i32, i32
  }
  func.func @transform_3(%arg0: i32, %arg1: i32) -> (i32, i32) {
    %c0_i32 = arith.constant 0 : i32
    %c0_i32_0 = arith.constant 0 : i32
    %c0_i32_1 = arith.constant 0 : i32
    return %c0_i32, %c0_i32_0 : i32, i32
  }
  func.func @transform_4(%arg0: i32, %arg1: i32) -> (i32, i32) {
    %c0_i32 = arith.constant 0 : i32
    %c0_i32_0 = arith.constant 0 : i32
    %c0_i32_1 = arith.constant 0 : i32
    return %c0_i32, %c0_i32_0 : i32, i32
  }
  func.func @transform_5(%arg0: i32, %arg1: i32) -> (i32, i32) {
    %c0_i32 = arith.constant 0 : i32
    %c0_i32_0 = arith.constant 0 : i32
    %c0_i32_1 = arith.constant 0 : i32
    return %c0_i32, %c0_i32_0 : i32, i32
  }
  func.func @transform_6(%arg0: i32, %arg1: i32) -> (i32, i32) {
    %c0_i32 = arith.constant 0 : i32
    %c0_i32_0 = arith.constant 0 : i32
    %c0_i32_1 = arith.constant 0 : i32
    return %c0_i32, %c0_i32_0 : i32, i32
  }
  func.func @transform_7(%arg0: i32, %arg1: i32) -> (i32, i32, i32) {
    %c0_i32 = arith.constant 0 : i32
    %c0_i32_0 = arith.constant 0 : i32
    return %arg0, %arg1, %c0_i32 : i32, i32, i32
  }
}

</mosaic_0001>

<bundles_post_ra>
// kernel: tpu_custom_call.1
= control target key start
LH: loop header
LB: loop body
LE: loop exit
PB: predicated region body
PF: predicated region fallthrough
CT: control target
= control target key end

     0   :  { %12 = vsyncpa [#allocation3], 0  ;;  %s1088_s0 = inlined_call_operand.vmem [shape: s32[2,1], index: 0, kind: input, shape index: {}]   ;;  %s1089_s1 = inlined_call_operand.hbm [shape: f32[2,16,128], index: 1, kind: input, shape index: {}]   ;;  %s1090_s2 = inlined_call_operand.hbm [shape: f32[2,16,128], index: 2, kind: input, shape index: {}]   ;;  %s1091_s3 = inlined_call_operand.vmem [shape: f32[1,128], index: 3, kind: input, shape index: {}]   ;;  %s1092_s4 = inlined_call_operand.vmem [shape: f32[1,128], index: 4, kind: input, shape index: {}]   ;;  %s1093_s5 = inlined_call_operand.hbm [shape: bf16[384,128], index: 5, kind: input, shape index: {}]   ;;  %s1094_s6 = inlined_call_operand.vmem [shape: f32[1,128], index: 6, kind: input, shape index: {}]   ;;  %s1095_s7 = inlined_call_operand.hbm [shape: f32[2,16,128], index: 7, kind: output, shape index: {}]  }
   0x1   :  { %13 = vsyncpa [#allocation6], 0 }
   0x2   :  { %14 = vsyncpa [#allocation4], 0  ;;  %s894_s24 = smov [#allocation5]   ;;  %s895_s26 = smov [#allocation2]  }
   0x3   :  { %s40_s25 = sshll.u32 %s894_s24, 4  ;;  %s28_s27 = sshll.u32 %s895_s26, 4  ;;  %s41_s25 = int_to_ptr.vmem [resolvable:$true] %s40_s25  ;;  %s947_s27 = int_to_ptr.vmem [resolvable:$true] %s28_s27 }
   0x4   :  { %s800_s30 = scalar_lea.hbm %s1090_s2, 512 }
   0x5   :  { %p801_p0 = scmp.ne.s32.totalorder %s1090_s2, %s800_s30  ;;  %p804_p1 = scmp.lt.u32.totalorder %s800_s30, %s1090_s2 }
   0x7   :  { %p806_p2 = pnand %p804_p1, %p801_p0 }
   0x9   :  { %809 = shalt.err (!%p806_p2)
}
   0xa   :  { %s810_s12 = scalar_lea.vmem %s41_s25, 512  ;;  %p815_p4 = scmp.lt.s32.totalorder %s41_s25, %s41_s25 }
   0xb   :  { %p811_p3 = scmp.ne.s32.totalorder %s41_s25, %s810_s12  ;;  %p816_p5 = scmp.lt.s32.totalorder %s810_s12, %s810_s12 }
   0xd   :  { %p817_p6 = por %p816_p5, %p815_p4 }
   0xf   :  { %p818_p7 = pnand %p817_p6, %p811_p3 }
  0x11   :  { %821 = shalt.err (!%p818_p7)
}
  0x12   :  { %s896_s13 = smov 128   ;;  %s897_s14 = smov 8  }
  0x13   :  { %46 = dma.hbm_to_vmem [thread:$0]  %s1090_s2, 512, %s41_s25, [#allocation6], %s896_s13, %s896_s13, %s897_s14  }
  0x14   :  { %s822_s19 = scalar_lea.hbm %s1089_s1, 256  ;;  %s824_s24 = scalar_lea.hbm %s1089_s1, 512 }
  0x15   :  { %p823_p8 = scmp.ne.s32.totalorder %s1089_s1, %s822_s19  ;;  %p825_p9 = scmp.lt.u32.totalorder %s824_s24, %s822_s19 }
  0x16   :  { %p826_p10 = scmp.lt.u32.totalorder %s822_s19, %s1089_s1 }
  0x18   :  { %p827_p11 = por %p826_p10, %p825_p9 }
  0x1a   :  { %p828_p12 = pnand %p827_p11, %p823_p8 }
  0x1c   :  { %831 = shalt.err (!%p828_p12)
}
  0x1d   :  { %s832_s2 = scalar_lea.vmem %s947_s27, 256  ;;  %p837_p0 = scmp.lt.s32.totalorder %s947_s27, %s947_s27 }
  0x1e   :  { %p833_p13 = scmp.ne.s32.totalorder %s947_s27, %s832_s2  ;;  %p838_p1 = scmp.lt.s32.totalorder %s832_s2, %s832_s2 }
  0x20   :  { %p839_p2 = por %p838_p1, %p837_p0 }
  0x22   :  { %p840_p3 = pnand %p839_p2, %p833_p13 }
  0x24   :  { %843 = shalt.err (!%p840_p3)
}
  0x25   :  { %s898_s25 = smov 256   ;;  %s899_s8 = smov [#allocation7]  }
  0x26   :  { %34 = dma.hbm_to_vmem [thread:$0]  %s1089_s1, 256, %s947_s27, [#allocation3], %s898_s25, %s896_s13, %s897_s14  }
  0x27   :  { %s56_s9 = sshll.u32 %s899_s8, 4  ;;  %s844_s12 = scalar_lea.hbm %s1093_s5, 3072  ;;  %s57_s9 = int_to_ptr.vmem [resolvable:$true] %s56_s9 }
  0x28   :  { %p845_p4 = scmp.ne.s32.totalorder %s1093_s5, %s844_s12  ;;  %p848_p5 = scmp.lt.u32.totalorder %s844_s12, %s1093_s5 }
  0x2a   :  { %p850_p6 = pnand %p848_p5, %p845_p4 }
  0x2c   :  { %853 = shalt.err (!%p850_p6)
}
  0x2d   :  { %s854_s19 = scalar_lea.vmem %s57_s9, 3072  ;;  %p859_p8 = scmp.lt.s32.totalorder %s57_s9, %s57_s9 }
  0x2e   :  { %p855_p7 = scmp.ne.s32.totalorder %s57_s9, %s854_s19  ;;  %p860_p9 = scmp.lt.s32.totalorder %s854_s19, %s854_s19 }
  0x30   :  { %p861_p10 = por %p860_p9, %p859_p8 }
  0x32   :  { %p862_p11 = pnand %p861_p10, %p855_p7 }
  0x34   :  { %865 = shalt.err (!%p862_p11)
}
  0x35   :  { %s900_s1 = smov 64   ;;  %s901_s27 = smov 4  }
  0x36   :  { %62 = dma.hbm_to_vmem [thread:$0]  %s1093_s5, 3072, %s57_s9, [#allocation6], %s900_s1, %s900_s1, %s901_s27  }
  0x37   :  { %888 = dma.done.wait [#allocation3], 256  }
  0x38   :  { %889 = vsyncadd [#allocation3], 4294967040 }
  0x39   :  { %890 = dma.done.wait [#allocation6], 3584  }
  0x3a   :  { %891 = vsyncadd [#allocation6], 4294963712  ;;  %v105_v0 = vlaneseq  ;;  %v902_v1 = vmov 0   ;;  %v903_v2 = vmov 1966171168   ;;  %v83_v25 = vld [vmem:[#allocation5 + $0x8] sm:$0xff] }
  0x3b   :  { %763 = vset.pattern.permute.xlu1 %v902_v1  ;;  %762 = vset.pattern.permute.xlu0 %v902_v1  ;;  %v124_v3 = vunpack.c.l.s4 %v903_v2  ;;  %v656_v13 = vld.sshfl [vmem:[%s1088_s0] sm:$0x11 pattern:$0x75316420]  ;;  %v82_v26 = vld [vmem:[#allocation5] sm:$0xff]  ;;  %v92_v27 = vrot.slane %v83_v25, 4 }
  0x3c   :  { %v106_v4 = vshrl.u32 %v105_v0, 7  ;;  %v122_v15 = vcombine.high %v656_v13, %v656_v13  ;;  %v91_v28 = vrot.slane %v82_v26, 4  ;;  %v85_v29 = vld [vmem:[#allocation5 + $0x18] sm:$0xff]  ;;  %vm90_vm6 = vcmask 1043456   ;;  %v80_v32 = vld [vmem:[#allocation2 + $0x4] sm:$0xf] }
  0x3d   :  { %v125_v5 = vunpack.c.0.s8 %v124_v3  ;;  %v95_v34 = vrot.slane %v85_v29, 4  ;;  %v84_v39 = vld [vmem:[#allocation5 + $0x10] sm:$0xff]  ;;  %v81_v47 = vld [vmem:[#allocation2 + $0xc] sm:$0xf]  ;;  %v764_v53 = vld [vmem:[#allocation7 + $0x40] sm:$0xff]   ;;  %v188_v54 = vand.u32 127, %v105_v0 }
  0x3e   :  { %v108_v6 = vadd.s32 16, %v106_v4  ;;  %v107_v7 = vadd.s32 8, %v106_v4  ;;  %v139_v10 = vsub.s32 0, %v106_v4  ;;  %v999_v12 = vadd.s32 4294967292, %v106_v4  ;;  %691 = vmatprep.subr.bf16.mxu0 %v764_v53  ;;  %v765_v26 = vld [vmem:[#allocation7] sm:$0xff]   ;;  %s906_s28 = smov [#allocation8]  }
  0x3f   :  { %v128_v8 = vsub.s32 %v125_v5, %v106_v4  ;;  %v103_v36 = vsel %vm90_vm6, %v80_v32, %v91_v28  ;;  %v93_v40 = vsel %vm90_vm6, %v91_v28, %v92_v27  ;;  %v94_v44 = vrot.slane %v84_v39, 4  ;;  %692 = vmatpush3.bf16.msra.mxu0 %v765_v26  ;;  %v767_v28 = vld [vmem:[#allocation7 + $0x8] sm:$0xff]   ;;  %v768_v29 = vld [vmem:[#allocation7 + $0x80] sm:$0xff]   ;;  %s641_s2 = sshll.u32 %s906_s28, 4  ;;  %s642_s2 = int_to_ptr.vmem [resolvable:$true] %s641_s2 }
  0x40   :  { %v113_v9 = vadd.s32 4294967292, %v108_v6  ;;  %v112_v11 = vadd.s32 4294967292, %v107_v7  ;;  %vm189_vm13 = vcmp.lt.s32.totalorder %v188_v54, 32  ;;  %v904_v61 = vmov 0.0   ;;  %729 = vmatprep.subr.bf16.mxu1 %v768_v29  ;;  %v771_v32 = vld [vmem:[#allocation7 + $0x88] sm:$0xff]   ;;  %p871_p13 = scmp.lt.s32.totalorder %s642_s2, %s642_s2 }
  0x41   :  { %v129_v14 = vrot.slane %v656_v13, %v128_v8  ;;  %v136_v17 = vrot.slane %v122_v15, %v128_v8  ;;  %v104_v48 = vsel %vm90_vm6, %v81_v47, %v94_v44  ;;  %v96_v51 = vsel %vm90_vm6, %v94_v44, %v95_v34  ;;  %730 = vmatpush3.bf16.msra.mxu1 %v768_v29  ;;  %v778_v39 = vld [vmem:[#allocation7 + $0x68] sm:$0xff]   ;;  %v786_v47 = vld [vmem:[#allocation7 + $0xb0] sm:$0xff]  }
  0x42   :  { %v657_v62 = vsel %vm189_vm13, 1.0, %v904_v61  ;;  %731 = vmatprep.subr.bf16.mxu1 %v771_v32  ;;  %v783_v44 = vld [vmem:[#allocation7 + $0xa8] sm:$0xff]   ;;  %vm294_vm14 = vcmp.ge.s32.totalorder %v999_v12, 0  ;;  %vm317_vm15 = vcmask 1046528  }
  0x43   :  { %v140_v16 = vrot.slane %v129_v14, %v139_v10  ;;  %v144_v18 = vrot.slane %v136_v17, %v139_v10 }
  0x45   :  { %vm147_vm0 = vcmp.ge.s32.totalorder %v113_v9, %v140_v16  ;;  %vm146_vm1 = vcmp.ge.s32.totalorder %v112_v11, %v140_v16  ;;  %vm145_vm2 = vcmp.ge.s32.totalorder %v999_v12, %v140_v16  ;;  %vm150_vm3 = vcmp.ge.s32.totalorder %v113_v9, %v144_v18  ;;  %732 = vmatpush3.bf16.msra.mxu1 %v771_v32 }
  0x46   :  { %v153_v19 = vsel %vm147_vm0, 1, %v902_v1  ;;  %v152_v20 = vsel %vm146_vm1, 1, %v902_v1  ;;  %v151_v21 = vsel %vm145_vm2, 1, %v902_v1  ;;  %v156_v22 = vsel %vm150_vm3, 1, %v902_v1 }
  0x47   :  { %164 = vperm.xlu0 %762, %v153_v19   ;;  %161 = vperm.xlu1 %763, %v152_v20   ;;  %vm149_vm4 = vcmp.ge.s32.totalorder %v112_v11, %v144_v18  ;;  %vm148_vm5 = vcmp.ge.s32.totalorder %v999_v12, %v144_v18  ;;  %vm326_vm0 = vcmask 1045504   ;;  %vm905_vm1 = vmmov 1  }
  0x48   :  { %v155_v23 = vsel %vm149_vm4, 1, %v902_v1  ;;  %v154_v24 = vsel %vm148_vm5, 1, %v902_v1  ;;  %vm1056_vm2 = vmpackc.low %vm905_vm1, %vm294_vm14 }
  0x4b   :  { %158 = vperm.xlu0 %762, %v151_v21   ;;  %173 = vperm.xlu1 %763, %v156_v22  }
  0x4f   :  { %170 = vperm.xlu1 %763, %v155_v23   ;;  %167 = vperm.xlu0 %762, %v154_v24  }
  0xc6   :  { %v165_v30 = vpop.permute.xlu0 %164  ;;  %v162_v31 = vpop.permute.xlu1 %161 }
  0xc7   :  { %vm177_vm7 = vcmp.eq.s32.totalorder %v165_v30, 1  ;;  %vm176_vm8 = vcmp.eq.s32.totalorder %v162_v31, 1  ;;  %v769_v30 = vld [vmem:[#allocation7 + $0x50] sm:$0xff]  }
  0xc8   :  { %v183_v33 = vsel %vm177_vm7, 0.0, %v92_v27  ;;  %v182_v46 = vsel %vm176_vm8, 0.0, %v93_v40  ;;  %v766_v27 = vld [vmem:[#allocation7 + $0x48] sm:$0xff]   ;;  %v770_v31 = vld [vmem:[#allocation7 + $0x10] sm:$0xff]  }
  0xc9   :  { %v196_v35 = vsel %vm90_vm6, %v183_v33, 0.0  ;;  %693 = vmatprep.subr.bf16.mxu0 %v766_v27  ;;  %v779_v40 = vld [vmem:[#allocation7 + $0x28] sm:$0xff]  }
  0xca   :  { %v159_v37 = vpop.permute.xlu0 %158  ;;  %v174_v38 = vpop.permute.xlu1 %173  ;;  %197 = vadd.xlane.f32.xlu1 %v196_v35  ;;  %694 = vmatpush3.bf16.msra.mxu0 %v767_v28  ;;  %v774_v35 = vld [vmem:[#allocation7 + $0x90] sm:$0xff]  }
  0xcb   :  { %vm175_vm9 = vcmp.eq.s32.totalorder %v159_v37, 1  ;;  %vm180_vm10 = vcmp.eq.s32.totalorder %v174_v38, 1  ;;  %695 = vmatprep.subr.bf16.mxu0 %v769_v30  ;;  %733 = vmatprep.subr.bf16.mxu1 %v774_v35  ;;  %v776_v37 = vld [vmem:[#allocation7 + $0x20] sm:$0xff]   ;;  %v777_v38 = vld [vmem:[#allocation7 + $0x98] sm:$0xff]  }
  0xcc   :  { %v181_v41 = vsel %vm175_vm9, 0.0, %v103_v36  ;;  %v186_v42 = vsel %vm180_vm10, 0.0, %v95_v34  ;;  %v773_v34 = vld [vmem:[#allocation7 + $0x18] sm:$0xff]   ;;  %v775_v36 = vld [vmem:[#allocation7 + $0x60] sm:$0xff]   ;;  %734 = vmatpush3.bf16.msra.mxu1 %v774_v35 }
  0xcd   :  { %192 = vadd.xlane.f32.xlu0 %v181_v41  ;;  %v203_v43 = vsel %vm90_vm6, %v186_v42, 0.0  ;;  %735 = vmatprep.subr.bf16.mxu1 %v777_v38 }
  0xce   :  { %v168_v45 = vpop.permute.xlu0 %167  ;;  %204 = vadd.xlane.f32.xlu1 %v203_v43  ;;  %v171_v49 = vpop.permute.xlu1 %170  ;;  %696 = vmatpush3.bf16.msra.mxu0 %v770_v31  ;;  %v782_v43 = vld [vmem:[#allocation7 + $0x30] sm:$0xff]  }
  0xcf   :  { %vm178_vm11 = vcmp.eq.s32.totalorder %v168_v45, 1  ;;  %vm179_vm12 = vcmp.eq.s32.totalorder %v171_v49, 1  ;;  %v784_v45 = vld [vmem:[#allocation7 + $0x78] sm:$0xff]  }
  0xd0   :  { %v184_v50 = vsel %vm178_vm11, 0.0, %v104_v48  ;;  %v185_v52 = vsel %vm179_vm12, 0.0, %v96_v51  ;;  %736 = vmatpush3.bf16.msra.mxu1 %v777_v38  ;;  %v787_v48 = vld [vmem:[#allocation7 + $0xb8] sm:$0xff]  }
  0xd1   :  { %194 = vadd.xlane.f32.xlu0 %v182_v46 }
  0xd5   :  { %199 = vadd.xlane.f32.xlu0 %v184_v50 }
  0xd9   :  { %201 = vadd.xlane.f32.xlu0 %v185_v52 }
 0x157   :  { %v198_v55 = vpop.xlane.xlu1 %197 }
 0x158   :  { %v208_v56 = vmul.f32 0.03125, %v198_v55 }
 0x15a   :  { %v214_v57 = vsub.f32 %v183_v33, %v208_v56  ;;  %v193_v58 = vpop.xlane.xlu0 %192  ;;  %v772_v33 = vld [vmem:[#allocation7 + $0x58] sm:$0xff]  }
 0x15b   :  { %v206_v59 = vmul.f32 0.03125, %v193_v58  ;;  %v205_v60 = vpop.xlane.xlu1 %204  ;;  %697 = vmatprep.subr.bf16.mxu0 %v772_v33 }
 0x15c   :  { %v211_v1 = vmul.f32 0.03125, %v205_v60  ;;  %v1013_v3 = vmul.f32 %v657_v62, %v214_v57  ;;  %698 = vmatpush3.bf16.msra.mxu0 %v773_v34 }
 0x15d   :  { %v212_v63 = vsub.f32 %v181_v41, %v206_v59  ;;  %699 = vmatprep.subr.bf16.mxu0 %v775_v36  ;;  %v780_v41 = vld [vmem:[#allocation7 + $0xa0] sm:$0xff]  }
 0x15e   :  { %v195_v2 = vpop.xlane.xlu0 %194  ;;  %v217_v7 = vsub.f32 %v186_v42, %v211_v1  ;;  %v226_v9 = vmul.f32 %v1013_v3, %v1013_v3  ;;  %v781_v42 = vld [vmem:[#allocation7 + $0x70] sm:$0xff]   ;;  %737 = vmatprep.subr.bf16.mxu1 %v780_v41 }
 0x15f   :  { %v207_v4 = vmul.f32 0.03125, %v195_v2  ;;  %v1015_v5 = vmul.f32 %v657_v62, %v212_v63  ;;  %738 = vmatpush3.bf16.msra.mxu1 %v780_v41 }
 0x160   :  { %v234_v16 = vsel %vm90_vm6, %v226_v9, 0.0  ;;  %v1026_v17 = vmul.f32 %v657_v62, %v217_v7  ;;  %700 = vmatpush3.bf16.msra.mxu0 %v776_v37  ;;  %739 = vmatprep.subr.bf16.mxu1 %v783_v44 }
 0x161   :  { %v213_v6 = vsub.f32 %v182_v46, %v207_v4  ;;  %v224_v0 = vmul.f32 %v1015_v5, %v1015_v5  ;;  %701 = vmatprep.subr.bf16.mxu0 %v778_v39  ;;  %v785_v46 = vld [vmem:[#allocation7 + $0x38] sm:$0xff]  }
 0x162   :  { %v200_v8 = vpop.xlane.xlu0 %199  ;;  %v229_v22 = vmul.f32 %v1026_v17, %v1026_v17 }
 0x163   :  { %v209_v10 = vmul.f32 0.03125, %v200_v8  ;;  %230 = vadd.xlane.f32.xlu1 %v224_v0  ;;  %v1021_v11 = vmul.f32 %v657_v62, %v213_v6  ;;  %740 = vmatpush3.bf16.msra.mxu1 %v783_v44  ;;  %v658_v0 = vld [vmem:[%s1091_s3] ss:$0 sm:$0xff] }
 0x164   :  { %v241_v25 = vsel %vm90_vm6, %v229_v22, 0.0  ;;  %702 = vmatpush3.bf16.msra.mxu0 %v779_v40  ;;  %741 = vmatprep.subr.bf16.mxu1 %v786_v47 }
 0x165   :  { %v215_v13 = vsub.f32 %v184_v50, %v209_v10  ;;  %v225_v14 = vmul.f32 %v1021_v11, %v1021_v11  ;;  %703 = vmatprep.subr.bf16.mxu0 %v781_v42  ;;  %v659_v10 = vld [vmem:[%s1092_s4] ss:$0 sm:$0xff] }
 0x166   :  { %v202_v15 = vpop.xlane.xlu0 %201 }
 0x167   :  { %v210_v18 = vmul.f32 0.03125, %v202_v15  ;;  %235 = vadd.xlane.f32.xlu1 %v234_v16  ;;  %232 = vadd.xlane.f32.xlu0 %v225_v14  ;;  %v1028_v19 = vmul.f32 %v657_v62, %v215_v13 }
 0x168   :  { %704 = vmatpush3.bf16.msra.mxu0 %v782_v43  ;;  %742 = vmatpush3.bf16.msra.mxu1 %v786_v47 }
 0x169   :  { %v216_v20 = vsub.f32 %v185_v52, %v210_v18  ;;  %v227_v21 = vmul.f32 %v1028_v19, %v1028_v19  ;;  %705 = vmatprep.subr.bf16.mxu0 %v784_v45  ;;  %743 = vmatprep.subr.bf16.mxu1 %v787_v48 }
 0x16b   :  { %237 = vadd.xlane.f32.xlu0 %v227_v21  ;;  %v1034_v23 = vmul.f32 %v657_v62, %v216_v20 }
 0x16c   :  { %706 = vmatpush3.bf16.msra.mxu0 %v785_v46  ;;  %744 = vmatpush3.bf16.msra.mxu1 %v787_v48 }
 0x16d   :  { %v228_v24 = vmul.f32 %v1034_v23, %v1034_v23 }
 0x16f   :  { %242 = vadd.xlane.f32.xlu0 %v241_v25  ;;  %239 = vadd.xlane.f32.xlu1 %v228_v24 }
 0x1f0   :  { %v231_v49 = vpop.xlane.xlu1 %230 }
 0x1f1   :  { %v244_v50 = vmul.f32 0.03125, %v231_v49 }
 0x1f3   :  { %v250_v51 = vadd.f32 1e-05, %v244_v50 }
 0x1f4   :  { %v236_v52 = vpop.xlane.xlu1 %235  ;;  %v233_v53 = vpop.xlane.xlu0 %232 }
 0x1f5   :  { %788 = vrsqrt.f32 %v250_v51  ;;  %v246_v54 = vmul.f32 0.03125, %v236_v52  ;;  %v245_v55 = vmul.f32 0.03125, %v233_v53 }
 0x1f7   :  { %v252_v56 = vadd.f32 1e-05, %v246_v54  ;;  %v251_v57 = vadd.f32 1e-05, %v245_v55 }
 0x1f8   :  { %v238_v58 = vpop.xlane.xlu0 %237 }
 0x1f9   :  { %790 = vrsqrt.f32 %v252_v56  ;;  %v247_v59 = vmul.f32 0.03125, %v238_v58  ;;  %v660_v56 = vld [vmem:[%s1094_s6] ss:$0 sm:$0xff]  ;;  %s866_s6 = scalar_lea.vmem %s642_s2, 512 }
 0x1fa   :  { %792 = vrsqrt.f32 %v251_v57  ;;  %p867_p12 = scmp.ne.s32.totalorder %s642_s2, %s866_s6  ;;  %p872_p0 = scmp.lt.s32.totalorder %s866_s6, %s866_s6 }
 0x1fb   :  { %v253_v60 = vadd.f32 1e-05, %v247_v59 }
 0x1fc   :  { %v240_v61 = vpop.xlane.xlu1 %239  ;;  %v243_v62 = vpop.xlane.xlu0 %242  ;;  %p873_p1 = por %p872_p0, %p871_p13 }
 0x1fd   :  { %794 = vrsqrt.f32 %v253_v60  ;;  %v248_v63 = vmul.f32 0.03125, %v240_v61  ;;  %v249_v1 = vmul.f32 0.03125, %v243_v62 }
 0x1fe   :  { %p874_p2 = pnand %p873_p1, %p867_p12 }
 0x1ff   :  { %v789_v2 = vpop.eup %788  ;;  %v254_v4 = vadd.f32 1e-05, %v248_v63  ;;  %v255_v6 = vadd.f32 1e-05, %v249_v1 }
 0x200   :  { %v262_v7 = vmul.f32 %v789_v2, %v1015_v5 }
 0x201   :  { %796 = vrsqrt.f32 %v254_v4 }
 0x202   :  { %798 = vrsqrt.f32 %v255_v6  ;;  %v275_v8 = vmul.f32 %v658_v0, %v262_v7 }
 0x203   :  { %v791_v9 = vpop.eup %790 }
 0x204   :  { %v793_v13 = vpop.eup %792  ;;  %v264_v14 = vmul.f32 %v791_v9, %v1013_v3  ;;  %v288_v18 = vadd.f32 %v659_v10, %v275_v8 }
 0x205   :  { %v263_v15 = vmul.f32 %v793_v13, %v1021_v11 }
 0x206   :  { %v277_v16 = vmul.f32 %v658_v0, %v264_v14  ;;  %v303_v25 = vsel %vm294_vm14, %v288_v18, 0.0 }
 0x207   :  { %v795_v20 = vpop.eup %794  ;;  %v276_v21 = vmul.f32 %v658_v0, %v263_v15 }
 0x208   :  { %v265_v5 = vmul.f32 %v795_v20, %v1028_v19  ;;  %v290_v22 = vadd.f32 %v659_v10, %v277_v16 }
 0x209   :  { %v289_v24 = vadd.f32 %v659_v10, %v276_v21 }
 0x20a   :  { %v310_v26 = vpack.c.bf16 %v290_v22, %v290_v22  ;;  %v278_v27 = vmul.f32 %v658_v0, %v265_v5 }
 0x20b   :  { %v797_v28 = vpop.eup %796  ;;  %v309_v29 = vpack.c.bf16 %v289_v24, %v303_v25  ;;  %v686_v38 = vpack.c.bf16 %v289_v24, %v288_v18 }
 0x20c   :  { %v799_v3 = vpop.eup %798  ;;  %v266_v11 = vmul.f32 %v797_v28, %v1034_v23  ;;  %v319_v30 = vrot.slane %v310_v26, 1  ;;  %v328_v31 = vrot.slane %v310_v26, 2  ;;  %v291_v34 = vadd.f32 %v659_v10, %v278_v27 }
 0x20d   :  { %v267_v32 = vmul.f32 %v799_v3, %v1026_v17  ;;  %v318_v33 = vrot.slane %v309_v29, 1  ;;  %v327_v19 = vrot.slane %v309_v29, 2 }
 0x20e   :  { %v279_v36 = vmul.f32 %v658_v0, %v266_v11  ;;  %v306_v41 = vsel %vm294_vm14, %v291_v34, 0.0 }
 0x20f   :  { %v320_v37 = vsel %vm317_vm15, %v318_v33, %v319_v30  ;;  %v329_v23 = vsel %vm326_vm0, %v327_v19, %v328_v31  ;;  %v280_v39 = vmul.f32 %v658_v0, %v267_v32 }
 0x210   :  { %566 = vmatprep.mubr.bf16.mxu0 %v320_v37  ;;  %745 = vmatprep.mubr.bf16.mxu1 %v329_v23  ;;  %v292_v17 = vadd.f32 %v659_v10, %v279_v36 }
 0x211   :  { %687 = vmatmul.mubr.msk.bf16.vlgmr.msra.gmra.mrb[0].mxu0 %vm1056_vm2, %v686_v38  ;;  %v293_v40 = vadd.f32 %v659_v10, %v280_v39 }
 0x212   :  { %v311_v42 = vpack.c.bf16 %v292_v17, %v306_v41  ;;  %v689_v50 = vpack.c.bf16 %v292_v17, %v291_v34 }
 0x213   :  { %v312_v43 = vpack.c.bf16 %v293_v40, %v293_v40 }
 0x214   :  { %v321_v44 = vrot.slane %v311_v42, 1  ;;  %v330_v45 = vrot.slane %v311_v42, 2 }
 0x215   :  { %v322_v46 = vrot.slane %v312_v43, 1  ;;  %v331_v47 = vrot.slane %v312_v43, 2 }
 0x217   :  { %v323_v48 = vsel %vm317_vm15, %v321_v44, %v322_v46  ;;  %v332_v49 = vsel %vm326_vm0, %v330_v45, %v331_v47 }
 0x218   :  { %574 = vmatprep.mubr.bf16.mxu0 %v323_v48  ;;  %746 = vmatmul.mubr.bf16.vlgmr.msra.gmra.mrb[0].mxu1 %v332_v49 }
 0x219   :  { %690 = vmatmul.mubr.msk.bf16.gmra.mrb[4].mxu0 %vm1056_vm2, %v689_v50 }
 0x2e4   :  { %v707_v51 = vpop.f32.mrb[0].mxu0 }
 0x2e5   :  { %v708_v52 = vpop.f32.mrb[1].mxu0 }
 0x2e6   :  { %v709_v12 = vadd.f32 %v708_v52, %v707_v51  ;;  %v710_v53 = vpop.f32.mrb[2].mxu0 }
 0x2e7   :  { %v711_v54 = vpop.f32.mrb[3].mxu0 }
 0x2e8   :  { %v712_v55 = vadd.f32 %v711_v54, %v710_v53  ;;  %v569_v58 = vadd.f32 %v709_v12, %v660_v56 }
 0x2ea   :  { %v572_v1 = vadd.f32 %v712_v55, %v660_v56 }
 0x2eb   :  { %v747_v57 = vpop.f32.mrb[0].mxu1 }
 0x2ec   :  { %v713_v59 = vpop.f32.mrb[4].mxu0  ;;  %v617_v60 = vpop.f32.mrb[1].mxu1 }
 0x2ed   :  { %v618_v61 = vadd.f32 %v617_v60, %v569_v58  ;;  %v714_v62 = vpop.f32.mrb[5].mxu0  ;;  %v748_v63 = vpop.f32.mrb[2].mxu1 }
 0x2ee   :  { %v715_v2 = vadd.f32 %v714_v62, %v713_v59  ;;  %v716_v4 = vpop.f32.mrb[6].mxu0  ;;  %v620_v6 = vpop.f32.mrb[3].mxu1 }
 0x2ef   :  { %632 = vst [vmem:[#allocation8] sm:$0xff] %v618_v61  ;;  %v621_v0 = vadd.f32 %v620_v6, %v572_v1  ;;  %v717_v7 = vpop.f32.mrb[7].mxu0 }
 0x2f0   :  { %v577_v8 = vadd.f32 %v715_v2, %v660_v56  ;;  %v718_v9 = vadd.f32 %v717_v7, %v716_v4 }
 0x2f1   :  { %633 = vst [vmem:[#allocation8 + $0x8] sm:$0xff] %v621_v0 }
 0x2f2   :  { %v626_v10 = vadd.f32 %v747_v57, %v577_v8  ;;  %v580_v13 = vadd.f32 %v718_v9, %v660_v56 }
 0x2f4   :  { %634 = vst [vmem:[#allocation8 + $0x10] sm:$0xff] %v626_v10  ;;  %v629_v14 = vadd.f32 %v748_v63, %v580_v13 }
 0x2f6   :  { %635 = vst [vmem:[#allocation8 + $0x18] sm:$0xff] %v629_v14 }
 0x2f7   :  { %877 = shalt.err (!%p874_p2)
}
 0x2f8   :  { %s878_s30 = scalar_lea.hbm %s1095_s7, 512 }
 0x2f9   :  { %p879_p3 = scmp.ne.s32.totalorder %s1095_s7, %s878_s30  ;;  %p882_p4 = scmp.lt.u32.totalorder %s878_s30, %s1095_s7 }
 0x2fb   :  { %p884_p5 = pnand %p882_p4, %p879_p3 }
 0x2fd   :  { %887 = shalt.err (!%p884_p5)
}
 0x2fe   :  { %647 = dma.vmem_to_hbm [thread:$0]  %s642_s2, 512, %s1095_s7, [#allocation4], %s896_s13, %s896_s13, %s897_s14  }
 0x2ff   :  { %892 = dma.done.wait [#allocation4], 512  }
 0x300   :  { %893 = vsyncadd [#allocation4], 4294966784 }
 0x301   :  { %651 = vsyncpa [#allocation3], 1 }
 0x302   :  { %652 = vsyncpa [#allocation6], 1 }
 0x303   :  { %653 = vsyncpa [#allocation4], 1 }

</bundles_post_ra>
